<compile_context>
chip_gen: v6e
topology: v6e:2x2x1
jax: 0.10.0
libtpu: 0.0.40
codegen_flags: <defaults>
</compile_context>

<pallas_src>
import numpy as np
import jax
import jax.numpy as jnp
from jax.experimental import pallas as pl
from jax.experimental.pallas import tpu as pltpu


def _img_logscale_kernel(log_scale_ref, out_ref):
    # forward() just returns the parameter: identity copy on the scalar path.
    out_ref[0] = log_scale_ref[0]


def img_logscale_forward(log_scale: jax.Array, *, use_pallas: bool = False) -> jax.Array:
    """Pallas equivalent of Img_logscale.forward(): returns the parameter.

    Args:
      log_scale: float32 array of shape (1,), the module parameter.
      use_pallas: if False (default, recommended), return the parameter
        directly — there is no compute to fuse, so a standalone kernel only
        adds launch overhead.  If True, run the SMEM identity-copy kernel
        (useful only to exercise the Pallas path).

    Returns:
      float32 array of shape (1,), equal to the parameter.
    """
    if not use_pallas:
        # Optimal implementation on all TPU generations: forward() is an
        # identity on the parameter — no kernel launch at all.
        return log_scale

    # Optional Pallas path: SMEM-staged scalar identity, no grid, no aliasing.
    return pl.pallas_call(
        _img_logscale_kernel,
        out_shape=jax.ShapeDtypeStruct((1,), jnp.float32),
        in_specs=[pl.BlockSpec(memory_space=pltpu.MemorySpace.SMEM)],
        out_specs=pl.BlockSpec(memory_space=pltpu.MemorySpace.SMEM),
    )(log_scale)


def img_logscale_as_prefetch_operand(log_scale: jax.Array) -> jax.Array:
    """Preferred integration point for downstream Pallas kernels.

    Pass this (1,) array as the first operand of the consumer's
    `pltpu.PrefetchScalarGridSpec(num_scalar_prefetch=1, ...)` (or as an SMEM
    in_spec).  The scalar then rides the sld path inside the consumer's bundle
    budget — no dedicated kernel, no extra HBM round trip.
    """
    return log_scale


def make_img_logscale_params(scale: float = 1.0) -> jax.Array:
    """Deterministic parameter init, mirroring the PyTorch __init__."""
    return jnp.asarray(np.log(scale) * np.ones(1), dtype=jnp.float32)


if __name__ == "__main__":
    # The module's forward takes no tensor inputs; the PRNG key only follows
    # the harness convention.
    _ = jax.random.PRNGKey(0)

    scale = 2.0
    log_scale = make_img_logscale_params(scale)

    # Default (recommended) path: zero-overhead identity on the parameter.
    out_fast = jax.block_until_ready(img_logscale_forward(log_scale))

    # Pallas path, exercised once for validation (SMEM identity copy).
    out_pallas = jax.block_until_ready(img_logscale_forward(log_scale, use_pallas=True))

    expected = np.log(scale) * np.ones(1, dtype=np.float32)
    for out in (out_fast, out_pallas):
        assert out.shape == (1,), out.shape
        assert out.dtype == jnp.float32, out.dtype
        np.testing.assert_allclose(np.asarray(out), expected, rtol=1e-6, atol=1e-6)

    print("KERNEL_OK")
</pallas_src>

<mosaic_0001>
module attributes {stable_mosaic.version = 11 : i64} {
  func.func @_img_logscale_kernel(%arg0: memref<1xf32, #tpu.memory_space<smem>>, %arg1: memref<1xf32, #tpu.memory_space<smem>>) attributes {dimension_semantics = [], scalar_prefetch = 0 : i64, scratch_operands = 0 : i64, tpu.core_type = #tpu.core_type<tc>} {
    %c0 = arith.constant 0 : index
    %0 = memref.load %arg0[%c0] : memref<1xf32, #tpu.memory_space<smem>>
    %c0_0 = arith.constant 0 : index
    %1 = memref.load %arg1[%c0_0] : memref<1xf32, #tpu.memory_space<smem>>
    memref.store %0, %arg1[%c0_0] : memref<1xf32, #tpu.memory_space<smem>>
    return
  }
}

</mosaic_0001>

<bundles_post_ra>
// kernel: tpu_custom_call.1
= control target key start
LH: loop header
LB: loop body
LE: loop exit
PB: predicated region body
PF: predicated region fallthrough
CT: control target
= control target key end

     0   :  { %7 = vsyncpa [#allocation4], 0  ;;  %s37_s8 = smov [#allocation3]   ;;  %s54_s0 = inlined_call_operand.<no memory space> [shape: f32[1], index: 0, kind: input, shape index: {}]   ;;  %s55_s1 = inlined_call_operand.hbm [shape: f32[1], index: 1, kind: output, shape index: {}]  }
   0x1   :  { %12 = sst [smem:[#allocation3]] %s54_s0 }
   0x2   :  { %20 = dma.smem_to_hbm %s37_s8, 16, %s55_s1, [#allocation4]  }
   0x3   :  { %35 = dma.done.wait [#allocation4], 16  }
   0x4   :  { %36 = vsyncadd [#allocation4], 4294967280 }
   0x5   :  { %24 = sfence }
   0x6   :  { %25 = vsyncpa [#allocation4], 1 }

</bundles_post_ra>
